<compile_context>
chip_gen: v5e
topology: v5e:2x2
jax: 0.10.0
libtpu: 0.0.40
codegen_flags: <defaults>
</compile_context>

<pallas_src>
import jax
import jax.numpy as jnp
from jax import lax
from jax.experimental import pallas as pl
from jax.experimental.pallas import tpu as pltpu

_BN_EPS = 1e-5          # Python float (used only in the wrapper)
_NEG_PAD = -1e30        # -inf surrogate for maxpool edge padding
                        # (exact: every pooling window contains a finite center)


# --------------------------------------------------------------------------- #
# Phase 1: circular Conv1d(k=3) as three bf16 MXU matmuls + BN partial stats.
# --------------------------------------------------------------------------- #
def _conv_stats_kernel(x_ref, w_ref, b_ref, y_ref, stats_ref):
    # x_ref:    [Bt, L, C] f32      w_ref: [3, C, C] bf16     b_ref: [1, C] f32
    # y_ref:    [Bt, L, C] bf16     stats_ref: [1, 2, C] f32  (sum / sum-of-sq)
    Bt, L, C = x_ref.shape
    w0 = w_ref[0]                                   # tap multiplying x[t-1]
    w1 = w_ref[1]                                   # tap multiplying x[t]
    w2 = w_ref[2]                                   # tap multiplying x[t+1]
    bias = b_ref[...]                               # [1, C] f32

    s_acc = jnp.zeros((1, C), jnp.float32)
    ss_acc = jnp.zeros((1, C), jnp.float32)
    for b in range(Bt):                             # static unroll (Bt is small)
        xb = x_ref[b].astype(jnp.bfloat16)          # [L, C] bf16 (full-rate MXU)
        p0 = jnp.dot(xb, w0, preferred_element_type=jnp.float32)
        p1 = jnp.dot(xb, w1, preferred_element_type=jnp.float32)
        p2 = jnp.dot(xb, w2, preferred_element_type=jnp.float32)
        # Circular taps: y[t] = p0[t-1] + p1[t] + p2[t+1]  (roll the products).
        y = (pltpu.roll(p0, shift=1, axis=0) + p1
             + pltpu.roll(p2, shift=L - 1, axis=0) + bias)          # [L, C] f32
        y_ref[b] = y.astype(jnp.bfloat16)
        # BatchNorm partial statistics (per-channel), fused under the conv pass.
        s_acc = s_acc + jnp.sum(y, axis=0, keepdims=True)
        ss_acc = ss_acc + jnp.sum(y * y, axis=0, keepdims=True)
    stats_ref[0] = jnp.concatenate([s_acc, ss_acc], axis=0)         # [2, C]


# --------------------------------------------------------------------------- #
# Phase 2: BatchNorm affine apply + ELU + MaxPool1d(k=3, s=2, p=1).
# --------------------------------------------------------------------------- #
def _norm_pool_kernel(y_ref, scale_ref, shift_ref, o_ref, buf_ref):
    # y_ref: [Bt, L, C] bf16   scale/shift: [1, C] f32
    # o_ref: [Bt, L_out, C] f32   buf_ref: [L, C] f32 scratch
    Bt, L, C = y_ref.shape
    L_out = o_ref.shape[1]                          # #even rows = ceil(L/2)
    L_odd = L - L_out                               # #odd rows  = floor(L/2)
    scale = scale_ref[...]
    shift = shift_ref[...]
    neg = jnp.full((1, C), _NEG_PAD, jnp.float32)

    for b in range(Bt):                             # static unroll
        yn = y_ref[b].astype(jnp.float32) * scale + shift           # BN (affine)
        # ELU(alpha=1), overflow-safe.
        ye = jnp.where(yn > 0, yn, jnp.exp(jnp.minimum(yn, 0.0)) - 1.0)
        buf_ref[...] = ye
        # out[j] = max(ye[2j-1], ye[2j], ye[2j+1]); out-of-range rows -> -inf.
        ev = buf_ref[pl.ds(0, L_out, stride=2), :]                   # ye[2j]
        od = buf_ref[pl.ds(1, L_odd, stride=2), :]                   # ye[2j+1]
        od_next = od if L_odd == L_out else jnp.concatenate([od, neg], axis=0)
        od_prev = jnp.concatenate([neg, od[:L_out - 1, :]], axis=0)  # ye[2j-1]
        o_ref[b] = jnp.maximum(jnp.maximum(od_prev, ev), od_next).astype(o_ref.dtype)


# --------------------------------------------------------------------------- #
# Wrapper
# --------------------------------------------------------------------------- #
def _pick_bt(B, L, C):
    """Batches per grid step: amortize the ~0.35us per-step overhead while keeping
    blocks comfortably inside the default scoped VMEM (v7x: 64 MiB physical) and
    keeping >= 2 'parallel' grid steps so both v7x TensorCores stay busy."""
    x_block_budget = 4 * 1024 * 1024                 # bytes of f32 x per block
    bt = max(1, min(B, x_block_budget // max(1, L * C * 4)))
    if B >= 2:
        bt = min(bt, B // 2)
    bt = max(1, bt)
    while B % bt != 0:
        bt -= 1
    return bt


@jax.jit
def conv_layer_forward(x, w, bias, gamma, beta):
    """x: [B, L, C] f32; w: [C_out, C_in, 3] (PyTorch Conv1d weight); bias/gamma/beta: [C]."""
    B, L, C = x.shape
    L_out = (L - 1) // 2 + 1
    Bt = _pick_bt(B, L, C)
    nB = B // Bt

    # Per-tap weights [3, C_in, C_out], bf16 for the full-rate MXU path.
    w3 = jnp.stack([jnp.transpose(w[:, :, 0]),
                    jnp.transpose(w[:, :, 1]),
                    jnp.transpose(w[:, :, 2])], axis=0).astype(jnp.bfloat16)
    bias2 = bias.reshape(1, C).astype(jnp.float32)

    # ---- phase 1: conv (bf16 MXU) + packed BN partials, pipelined over B -----
    y, stats = pl.pallas_call(
        _conv_stats_kernel,
        out_shape=(jax.ShapeDtypeStruct((B, L, C), jnp.bfloat16),
                   jax.ShapeDtypeStruct((nB, 2, C), jnp.float32)),
        grid_spec=pltpu.PrefetchScalarGridSpec(
            num_scalar_prefetch=0,
            grid=(nB,),
            in_specs=[
                pl.BlockSpec((Bt, L, C), lambda i: (i, 0, 0)),
                pl.BlockSpec((3, C, C), lambda i: (0, 0, 0)),
                pl.BlockSpec((1, C), lambda i: (0, 0)),
            ],
            out_specs=(
                pl.BlockSpec((Bt, L, C), lambda i: (i, 0, 0)),
                pl.BlockSpec((1, 2, C), lambda i: (i, 0, 0)),
            )),
        compiler_params=pltpu.CompilerParams(dimension_semantics=("parallel",)),
    )(x, w3, bias2)

    # ---- tiny cross-batch reduction + BN affine coefficients (plain JAX) -----
    n = float(B * L)
    st = jnp.sum(stats, axis=0)                         # [2, C]
    mean = st[0] / n                                    # [C]
    var = jnp.maximum(st[1] / n - mean * mean, 0.0)     # biased var (training BN)
    inv = lax.rsqrt(var + _BN_EPS)
    scale_vec = gamma * inv                             # [C]
    shift_vec = beta - mean * scale_vec                 # [C]
    scale2 = scale_vec.reshape(1, C).astype(jnp.float32)
    shift2 = shift_vec.reshape(1, C).astype(jnp.float32)

    # ---- phase 2: normalize + ELU + even/odd maxpool, pipelined over B -------
    out = pl.pallas_call(
        _norm_pool_kernel,
        out_shape=jax.ShapeDtypeStruct((B, L_out, C), jnp.float32),
        grid_spec=pltpu.PrefetchScalarGridSpec(
            num_scalar_prefetch=0,
            grid=(nB,),
            in_specs=[
                pl.BlockSpec((Bt, L, C), lambda i: (i, 0, 0)),
                pl.BlockSpec((1, C), lambda i: (0, 0)),
                pl.BlockSpec((1, C), lambda i: (0, 0)),
            ],
            out_specs=pl.BlockSpec((Bt, L_out, C), lambda i: (i, 0, 0)),
            scratch_shapes=[pltpu.VMEM((L, C), jnp.float32)]),
        compiler_params=pltpu.CompilerParams(dimension_semantics=("parallel",)),
    )(y, scale2, shift2)
    return out


# --------------------------------------------------------------------------- #
# Pure-JAX reference matching the PyTorch module (training-mode BatchNorm).
# --------------------------------------------------------------------------- #
def _ref_forward(x, w, bias, gamma, beta):
    xc = jnp.transpose(x, (0, 2, 1))                                   # [B, C, L]
    xp = jnp.concatenate([xc[:, :, -1:], xc, xc[:, :, :1]], axis=-1)   # circular pad 1
    y = lax.conv_general_dilated(xp, w, window_strides=(1,), padding='VALID',
                                 dimension_numbers=('NCH', 'OIH', 'NCH'))
    y = y + bias[None, :, None]
    mean = jnp.mean(y, axis=(0, 2), keepdims=True)
    var = jnp.mean((y - mean) ** 2, axis=(0, 2), keepdims=True)
    yn = (y - mean) / jnp.sqrt(var + _BN_EPS) * gamma[None, :, None] + beta[None, :, None]
    ye = jnp.where(yn > 0, yn, jnp.exp(jnp.minimum(yn, 0.0)) - 1.0)
    L = x.shape[1]
    L_out = (L - 1) // 2 + 1
    yp_ = jnp.pad(ye, ((0, 0), (0, 0), (1, 1)), constant_values=-1e30)
    wins = jnp.stack([yp_[:, :, 2 * j:2 * j + 3] for j in range(L_out)], axis=2)
    out = jnp.max(wins, axis=-1)                                       # [B, C, L_out]
    return jnp.transpose(out, (0, 2, 1))


if __name__ == "__main__":
    B, L, C = 2, 16, 16
    key = jax.random.PRNGKey(0)
    kx, kw, kb = jax.random.split(key, 3)

    x = jax.random.normal(kx, (B, L, C), dtype=jnp.float32)
    fan_in = float(C * 3)
    w = jax.random.uniform(kw, (C, C, 3), jnp.float32, -1.0, 1.0) / jnp.sqrt(fan_in)
    bias = jax.random.uniform(kb, (C,), jnp.float32, -1.0, 1.0) / jnp.sqrt(fan_in)
    gamma = jnp.ones((C,), jnp.float32)    # BatchNorm1d default affine init
    beta = jnp.zeros((C,), jnp.float32)

    out = conv_layer_forward(x, w, bias, gamma, beta)
    out = jax.block_until_ready(out)

    ref = _ref_forward(x, w, bias, gamma, beta)
    assert out.shape == (B, (L - 1) // 2 + 1, C)
    # Tolerance covers the intentional bf16 matmul / bf16 intermediate path.
    assert jnp.allclose(out, ref, atol=3e-2, rtol=3e-2), \
        float(jnp.max(jnp.abs(out - ref)))
    print("KERNEL_OK")
</pallas_src>

<mosaic_0001>
module attributes {stable_mosaic.version = 11 : i64} {
  func.func @_conv_stats_kernel(%arg0: i32, %arg1: memref<1x16x16xf32, #tpu.memory_space<vmem>>, %arg2: memref<3x16x16xbf16, #tpu.memory_space<vmem>>, %arg3: memref<1x16xf32, #tpu.memory_space<vmem>>, %arg4: memref<1x16x16xbf16, #tpu.memory_space<vmem>>, %arg5: memref<1x2x16xf32, #tpu.memory_space<vmem>>) attributes {dimension_semantics = [#tpu.dimension_semantics<parallel>], iteration_bounds = array<i64: 2>, scalar_prefetch = 0 : i64, scratch_operands = 0 : i64, tpu.core_type = #tpu.core_type<tc>, window_params = [{transform_indices = @transform_0, window_bounds = array<i64: 1, 16, 16>}, {pipeline_mode = #tpu.pipeline_mode<synchronous>, transform_indices = @transform_1, window_bounds = array<i64: 3, 16, 16>}, {pipeline_mode = #tpu.pipeline_mode<synchronous>, transform_indices = @transform_2, window_bounds = array<i64: 1, 16>}, {transform_indices = @transform_3, window_bounds = array<i64: 1, 16, 16>}, {transform_indices = @transform_4, window_bounds = array<i64: 1, 2, 16>}]} {
    %c0 = arith.constant 0 : index
    %c0_0 = arith.constant 0 : index
    %c0_1 = arith.constant 0 : index
    %0 = vector.load %arg2[%c0, %c0_0, %c0_1] : memref<3x16x16xbf16, #tpu.memory_space<vmem>>, vector<1x16x16xbf16>
    %1 = vector.shape_cast %0 : vector<1x16x16xbf16> to vector<16x16xbf16>
    %c1 = arith.constant 1 : index
    %c0_2 = arith.constant 0 : index
    %c0_3 = arith.constant 0 : index
    %2 = vector.load %arg2[%c1, %c0_2, %c0_3] : memref<3x16x16xbf16, #tpu.memory_space<vmem>>, vector<1x16x16xbf16>
    %3 = vector.shape_cast %2 : vector<1x16x16xbf16> to vector<16x16xbf16>
    %c2 = arith.constant 2 : index
    %c0_4 = arith.constant 0 : index
    %c0_5 = arith.constant 0 : index
    %4 = vector.load %arg2[%c2, %c0_4, %c0_5] : memref<3x16x16xbf16, #tpu.memory_space<vmem>>, vector<1x16x16xbf16>
    %5 = vector.shape_cast %4 : vector<1x16x16xbf16> to vector<16x16xbf16>
    %c0_6 = arith.constant 0 : index
    %c0_7 = arith.constant 0 : index
    %6 = vector.load %arg3[%c0_6, %c0_7] : memref<1x16xf32, #tpu.memory_space<vmem>>, vector<1x16xf32>
    %cst = arith.constant 0.000000e+00 : f32
    %7 = vector.broadcast %cst : f32 to vector<1x16xf32>
    %cst_8 = arith.constant 0.000000e+00 : f32
    %8 = vector.broadcast %cst_8 : f32 to vector<1x16xf32>
    %c0_9 = arith.constant 0 : index
    %c0_10 = arith.constant 0 : index
    %c0_11 = arith.constant 0 : index
    %9 = vector.load %arg1[%c0_9, %c0_10, %c0_11] : memref<1x16x16xf32, #tpu.memory_space<vmem>>, vector<1x16x16xf32>
    %10 = vector.shape_cast %9 : vector<1x16x16xf32> to vector<16x16xf32>
    %11 = arith.truncf %10 : vector<16x16xf32> to vector<16x16xbf16>
    %cst_12 = arith.constant dense<0.000000e+00> : vector<16x16xf32>
    %12 = tpu.matmul %11, %1, %cst_12 {dimension_numbers = #tpu.dot_dimension_numbers<[1], [0], [0], [1], [0, 0, 1, 1], [], []>} : vector<16x16xbf16>, vector<16x16xbf16>, vector<16x16xf32> -> vector<16x16xf32>
    %cst_13 = arith.constant dense<0.000000e+00> : vector<16x16xf32>
    %13 = tpu.matmul %11, %3, %cst_13 {dimension_numbers = #tpu.dot_dimension_numbers<[1], [0], [0], [1], [0, 0, 1, 1], [], []>} : vector<16x16xbf16>, vector<16x16xbf16>, vector<16x16xf32> -> vector<16x16xf32>
    %cst_14 = arith.constant dense<0.000000e+00> : vector<16x16xf32>
    %14 = tpu.matmul %11, %5, %cst_14 {dimension_numbers = #tpu.dot_dimension_numbers<[1], [0], [0], [1], [0, 0, 1, 1], [], []>} : vector<16x16xbf16>, vector<16x16xbf16>, vector<16x16xf32> -> vector<16x16xf32>
    %c1_i32 = arith.constant 1 : i32
    %15 = tpu.dynamic_rotate %12 by %c1_i32 dim 0 : vector<16x16xf32>, i32 -> vector<16x16xf32>
    %16 = arith.addf %15, %13 : vector<16x16xf32>
    %c15_i32 = arith.constant 15 : i32
    %17 = tpu.dynamic_rotate %14 by %c15_i32 dim 0 : vector<16x16xf32>, i32 -> vector<16x16xf32>
    %18 = arith.addf %16, %17 : vector<16x16xf32>
    %19 = vector.broadcast %6 : vector<1x16xf32> to vector<16x16xf32>
    %20 = arith.addf %18, %19 : vector<16x16xf32>
    %21 = arith.truncf %20 : vector<16x16xf32> to vector<16x16xbf16>
    %c0_15 = arith.constant 0 : index
    %c0_16 = arith.constant 0 : index
    %c0_17 = arith.constant 0 : index
    %22 = vector.load %arg4[%c0_15, %c0_16, %c0_17] : memref<1x16x16xbf16, #tpu.memory_space<vmem>>, vector<1x16x16xbf16>
    %23 = vector.shape_cast %22 : vector<1x16x16xbf16> to vector<16x16xbf16>
    %24 = vector.shape_cast %21 : vector<16x16xbf16> to vector<1x16x16xbf16>
    tpu.vector_store %arg4[%c0_15, %c0_16, %c0_17], %24 {strides = array<i32>} : memref<1x16x16xbf16, #tpu.memory_space<vmem>>, vector<1x16x16xbf16>,
    %cst_18 = arith.constant dense<0.000000e+00> : vector<16xf32>
    %25 = vector.multi_reduction <add>, %20, %cst_18 [0] : vector<16x16xf32> to vector<16xf32>
    %26 = vector.shape_cast %25 : vector<16xf32> to vector<1x16xf32>
    %27 = arith.addf %7, %26 : vector<1x16xf32>
    %28 = arith.mulf %20, %20 : vector<16x16xf32>
    %cst_19 = arith.constant dense<0.000000e+00> : vector<16xf32>
    %29 = vector.multi_reduction <add>, %28, %cst_19 [0] : vector<16x16xf32> to vector<16xf32>
    %30 = vector.shape_cast %29 : vector<16xf32> to vector<1x16xf32>
    %31 = arith.addf %8, %30 : vector<1x16xf32>
    %32 = tpu.concatenate %27, %31 in 0 : vector<1x16xf32>, vector<1x16xf32> -> vector<2x16xf32>
    %c0_20 = arith.constant 0 : index
    %c0_21 = arith.constant 0 : index
    %c0_22 = arith.constant 0 : index
    %33 = vector.load %arg5[%c0_20, %c0_21, %c0_22] : memref<1x2x16xf32, #tpu.memory_space<vmem>>, vector<1x2x16xf32>
    %34 = vector.shape_cast %33 : vector<1x2x16xf32> to vector<2x16xf32>
    %35 = vector.shape_cast %32 : vector<2x16xf32> to vector<1x2x16xf32>
    tpu.vector_store %arg5[%c0_20, %c0_21, %c0_22], %35 {strides = array<i32>} : memref<1x2x16xf32, #tpu.memory_space<vmem>>, vector<1x2x16xf32>,
    return
  }
  func.func @transform_0(%arg0: i32) -> (i32, i32, i32) {
    %c0_i32 = arith.constant 0 : i32
    %c0_i32_0 = arith.constant 0 : i32
    %c0_i32_1 = arith.constant 0 : i32
    return %arg0, %c0_i32, %c0_i32_0 : i32, i32, i32
  }
  func.func @transform_1(%arg0: i32) -> (i32, i32, i32) {
    %c0_i32 = arith.constant 0 : i32
    %c0_i32_0 = arith.constant 0 : i32
    %c0_i32_1 = arith.constant 0 : i32
    %c0_i32_2 = arith.constant 0 : i32
    return %c0_i32, %c0_i32_0, %c0_i32_1 : i32, i32, i32
  }
  func.func @transform_2(%arg0: i32) -> (i32, i32) {
    %c0_i32 = arith.constant 0 : i32
    %c0_i32_0 = arith.constant 0 : i32
    %c0_i32_1 = arith.constant 0 : i32
    return %c0_i32, %c0_i32_0 : i32, i32
  }
  func.func @transform_3(%arg0: i32) -> (i32, i32, i32) {
    %c0_i32 = arith.constant 0 : i32
    %c0_i32_0 = arith.constant 0 : i32
    %c0_i32_1 = arith.constant 0 : i32
    return %arg0, %c0_i32, %c0_i32_0 : i32, i32, i32
  }
  func.func @transform_4(%arg0: i32) -> (i32, i32, i32) {
    %c0_i32 = arith.constant 0 : i32
    %c0_i32_0 = arith.constant 0 : i32
    %c0_i32_1 = arith.constant 0 : i32
    return %arg0, %c0_i32, %c0_i32_0 : i32, i32, i32
  }
}

module attributes {stable_mosaic.version = 11 : i64} {
  func.func @_norm_pool_kernel(%arg0: i32, %arg1: memref<1x16x16xbf16, #tpu.memory_space<vmem>>, %arg2: memref<1x16xf32, #tpu.memory_space<vmem>>, %arg3: memref<1x16xf32, #tpu.memory_space<vmem>>, %arg4: memref<1x8x16xf32, #tpu.memory_space<vmem>>, %arg5: memref<16x16xf32, #tpu.memory_space<vmem>>) attributes {dimension_semantics = [#tpu.dimension_semantics<parallel>], iteration_bounds = array<i64: 2>, scalar_prefetch = 0 : i64, scratch_operands = 1 : i64, tpu.core_type = #tpu.core_type<tc>, window_params = [{transform_indices = @transform_0, window_bounds = array<i64: 1, 16, 16>}, {pipeline_mode = #tpu.pipeline_mode<synchronous>, transform_indices = @transform_1, window_bounds = array<i64: 1, 16>}, {pipeline_mode = #tpu.pipeline_mode<synchronous>, transform_indices = @transform_2, window_bounds = array<i64: 1, 16>}, {transform_indices = @transform_3, window_bounds = array<i64: 1, 8, 16>}]} {
    %c0 = arith.constant 0 : index
    %c0_0 = arith.constant 0 : index
    %0 = vector.load %arg2[%c0, %c0_0] : memref<1x16xf32, #tpu.memory_space<vmem>>, vector<1x16xf32>
    %c0_1 = arith.constant 0 : index
    %c0_2 = arith.constant 0 : index
    %1 = vector.load %arg3[%c0_1, %c0_2] : memref<1x16xf32, #tpu.memory_space<vmem>>, vector<1x16xf32>
    %cst = arith.constant -1.000000e+30 : f32
    %2 = vector.broadcast %cst : f32 to vector<1x16xf32>
    %c0_3 = arith.constant 0 : index
    %c0_4 = arith.constant 0 : index
    %c0_5 = arith.constant 0 : index
    %3 = vector.load %arg1[%c0_3, %c0_4, %c0_5] : memref<1x16x16xbf16, #tpu.memory_space<vmem>>, vector<1x16x16xbf16>
    %4 = vector.shape_cast %3 : vector<1x16x16xbf16> to vector<16x16xbf16>
    %5 = arith.extf %4 : vector<16x16xbf16> to vector<16x16xf32>
    %6 = vector.broadcast %0 : vector<1x16xf32> to vector<16x16xf32>
    %7 = arith.mulf %5, %6 : vector<16x16xf32>
    %8 = vector.broadcast %1 : vector<1x16xf32> to vector<16x16xf32>
    %9 = arith.addf %7, %8 : vector<16x16xf32>
    %cst_6 = arith.constant 0.000000e+00 : f32
    %10 = vector.broadcast %cst_6 : f32 to vector<16x16xf32>
    %11 = arith.cmpf ogt, %9, %10 : vector<16x16xf32>
    %cst_7 = arith.constant 0.000000e+00 : f32
    %12 = vector.broadcast %cst_7 : f32 to vector<16x16xf32>
    %13 = arith.minimumf %9, %12 : vector<16x16xf32>
    %14 = math.exp %13 : vector<16x16xf32>
    %cst_8 = arith.constant 1.000000e+00 : f32
    %15 = vector.broadcast %cst_8 : f32 to vector<16x16xf32>
    %16 = arith.subf %14, %15 : vector<16x16xf32>
    %17 = arith.select %11, %9, %16 : vector<16x16xi1>, vector<16x16xf32>
    %c0_9 = arith.constant 0 : index
    %c0_10 = arith.constant 0 : index
    %18 = vector.load %arg5[%c0_9, %c0_10] : memref<16x16xf32, #tpu.memory_space<vmem>>, vector<16x16xf32>
    tpu.vector_store %arg5[%c0_9, %c0_10], %17 {strides = array<i32>} : memref<16x16xf32, #tpu.memory_space<vmem>>, vector<16x16xf32>,
    %c0_11 = arith.constant 0 : index
    %c0_12 = arith.constant 0 : index
    %19 = tpu.strided_load %arg5[%c0_11, %c0_12] {strides = array<i32: 2, 1>} : memref<16x16xf32, #tpu.memory_space<vmem>>, vector<8x16xf32>
    %c1 = arith.constant 1 : index
    %c0_13 = arith.constant 0 : index
    %20 = tpu.strided_load %arg5[%c1, %c0_13] {strides = array<i32: 2, 1>} : memref<16x16xf32, #tpu.memory_space<vmem>>, vector<8x16xf32>
    %21 = vector.extract_strided_slice %20 {offsets = [0, 0], sizes = [7, 16], strides = [1, 1]} : vector<8x16xf32> to vector<7x16xf32>
    %22 = tpu.concatenate %2, %21 in 0 : vector<1x16xf32>, vector<7x16xf32> -> vector<8x16xf32>
    %23 = arith.maximumf %22, %19 : vector<8x16xf32>
    %24 = arith.maximumf %23, %20 : vector<8x16xf32>
    %c0_14 = arith.constant 0 : index
    %c0_15 = arith.constant 0 : index
    %c0_16 = arith.constant 0 : index
    %25 = vector.load %arg4[%c0_14, %c0_15, %c0_16] : memref<1x8x16xf32, #tpu.memory_space<vmem>>, vector<1x8x16xf32>
    %26 = vector.shape_cast %25 : vector<1x8x16xf32> to vector<8x16xf32>
    %27 = vector.shape_cast %24 : vector<8x16xf32> to vector<1x8x16xf32>
    tpu.vector_store %arg4[%c0_14, %c0_15, %c0_16], %27 {strides = array<i32>} : memref<1x8x16xf32, #tpu.memory_space<vmem>>, vector<1x8x16xf32>,
    return
  }
  func.func @transform_0(%arg0: i32) -> (i32, i32, i32) {
    %c0_i32 = arith.constant 0 : i32
    %c0_i32_0 = arith.constant 0 : i32
    %c0_i32_1 = arith.constant 0 : i32
    return %arg0, %c0_i32, %c0_i32_0 : i32, i32, i32
  }
  func.func @transform_1(%arg0: i32) -> (i32, i32) {
    %c0_i32 = arith.constant 0 : i32
    %c0_i32_0 = arith.constant 0 : i32
    %c0_i32_1 = arith.constant 0 : i32
    return %c0_i32, %c0_i32_0 : i32, i32
  }
  func.func @transform_2(%arg0: i32) -> (i32, i32) {
    %c0_i32 = arith.constant 0 : i32
    %c0_i32_0 = arith.constant 0 : i32
    %c0_i32_1 = arith.constant 0 : i32
    return %c0_i32, %c0_i32_0 : i32, i32
  }
  func.func @transform_3(%arg0: i32) -> (i32, i32, i32) {
    %c0_i32 = arith.constant 0 : i32
    %c0_i32_0 = arith.constant 0 : i32
    %c0_i32_1 = arith.constant 0 : i32
    return %arg0, %c0_i32, %c0_i32_0 : i32, i32, i32
  }
}

</mosaic_0001>

<bundles_post_ra>
// kernel: conv_layer_forward.2
= control target key start
LH: loop header
LB: loop body
LE: loop exit
PB: predicated region body
PF: predicated region fallthrough
CT: control target
= control target key end

     0   :  { %s502_s15 = smov 0   ;;  %s546_s0 = inlined_call_operand.vmem [shape: f32[2,16,16], index: 0, kind: input, shape index: {}]   ;;  %s547_s1 = inlined_call_operand.vmem [shape: bf16[3,16,16], index: 1, kind: input, shape index: {}]   ;;  %s548_s2 = inlined_call_operand.vmem [shape: f32[1,16], index: 2, kind: input, shape index: {}]   ;;  %s549_s3 = inlined_call_operand.vmem [shape: bf16[2,16,16], index: 3, kind: output, shape index: {0}]   ;;  %s550_s4 = inlined_call_operand.vmem [shape: f32[2,2,16], index: 4, kind: output, shape index: {1}]  }
   0x1 LB: > { %s424_s16 = sadd.s32 4294967295, %s475_s15   ;;  %p428_p0 = scmp.ge.s32.totalorder %s475_s15, 1  ;;  %s475_s15 = sphi %s502_s15, %s15_s15  }
   0x2   : > { %p165_p1 = scmp.lt.s32.totalorder %s475_s15, 3 }
   0x4   : > { %p166_p2 = pnand %p428_p0, %p165_p1 }
   0x5   : > { %p195_p3 = scmp.lt.s32.totalorder (!%p166_p2), %s424_s16, 1 }
   0x6   : > { %169 = sbr.rel (%p166_p2) target bundleno = 185 (0xb9), region = 32 }
   0xb   : > { %v457_v0 = vld [vmem:[%s547_s1] sm:$0xff]  ;;  %v458_v1 = vld [vmem:[%s547_s1 + $0x8] sm:$0xff]  ;;  %v459_v2 = vld [vmem:[%s547_s1 + $0x10] sm:$0xff]  ;;  %s552_s16 = smov (!%p195_p3, %s424_s16), 1  ;;  %vm228_vm0 = vcmask 130048   ;;  %v288_v7 = vlaneseq  ;;  %vm309_vm3 = vcmask 125952  }
   0xc   : > { %239 = vmatpush.bf16.msra.mxu0 %v457_v0  ;;  %259 = vmatpush.bf16.msra.mxu1 %v458_v1  ;;  %s455_s23 = sshll.u32 %s552_s16, 4  ;;  %v468_v22 = vld [vmem:[%s548_s2] ss:$0 sm:$0xff]  ;;  %s456_s29 = sshll.u32 %s552_s16, 3  ;;  %vm334_vm4 = vcmask 1040384   ;;  %vm336_vm5 = vcmask 123904  }
   0xd   : > { %279 = vmatpush.bf16.msra.mxu2 %v459_v2  ;;  %s199_s26 = scalar_lea.vmem %s546_s0, %s455_s23  ;;  %v289_v10 = vshrl.u32 %v288_v7, 7  ;;  %s204_s6 = scalar_lea.vmem %s549_s3, %s456_s29 }
   0xe   : > { %v219_v3 = vld [vmem:[%s199_s26] sm:$0xff]  ;;  %v220_v4 = vld [vmem:[%s199_s26 + $0x8] sm:$0xff]  ;;  %s433_s7 = sshll.u32 %s552_s16, 1 }
   0xf   : > { %v221_v5 = vpack.c.bf16 %v220_v4, %v219_v3  ;;  %vm290_vm1 = vcmp.lt.s32.totalorder %v289_v10, 1  ;;  %vm297_vm2 = vcmp.lt.s32.totalorder %v289_v10, 7  ;;  %s208_s10 = scalar_lea.vmem %s550_s4, %s433_s7 }
  0x11   : > { %442 = vmatmul.msk.bf16.vlgmr.msra.gmra.mxu0 %vm228_vm0, %v221_v5  ;;  %447 = vmatmul.msk.bf16.vlgmr.msra.gmra.mxu1 %vm228_vm0, %v221_v5 }
  0x12   : > { %452 = vmatmul.msk.bf16.vlgmr.msra.gmra.mxu2 %vm228_vm0, %v221_v5 }
  0x8e   : > { %v241_v6 = vpop.f32.mrf.mxu0  ;;  %v261_v8 = vpop.f32.mrf.mxu1 }
  0x8f   : > { %v286_v13 = vrot.slane %v241_v6, 7 }
  0x95   : > { %v281_v9 = vpop.f32.mrf.mxu2 }
  0x96   : > { %v243_v11 = vpop.f32.mrf.mxu0  ;;  %v295_v17 = vrot.slane %v281_v9, 1  ;;  %v263_v18 = vpop.f32.mrf.mxu1 }
  0x97   : > { %v287_v12 = vrot.slane %v243_v11, 7 }
  0x99   : > { %v291_v14 = vsel %vm290_vm1, %v286_v13, %v287_v12  ;;  %v292_v15 = vsel %vm290_vm1, %v287_v12, %v286_v13 }
  0x9a   : > { %v293_v20 = vadd.f32 %v292_v15, %v261_v8  ;;  %v294_v21 = vadd.f32 %v291_v14, %v263_v18 }
  0x9d   : > { %v283_v16 = vpop.f32.mrf.mxu2 }
  0x9e   : > { %v296_v19 = vrot.slane %v283_v16, 1 }
  0xa0   : > { %v298_v23 = vsel %vm297_vm2, %v295_v17, %v296_v19  ;;  %v299_v24 = vsel %vm297_vm2, %v296_v19, %v295_v17 }
  0xa1   : > { %v300_v25 = vadd.f32 %v298_v23, %v293_v20  ;;  %v301_v26 = vadd.f32 %v299_v24, %v294_v21 }
  0xa3   : > { %v305_v27 = vadd.f32 %v468_v22, %v300_v25  ;;  %v306_v28 = vadd.f32 %v468_v22, %v301_v26 }
  0xa5   : > { %v307_v29 = vpack.c.bf16 %v305_v27, %v305_v27  ;;  %v308_v30 = vpack.c.bf16 %v306_v28, %v306_v28  ;;  %v312_v31 = vsel %vm228_vm0, %v305_v27, 0.0  ;;  %v313_v32 = vsel %vm228_vm0, %v306_v28, 0.0 }
  0xa6   : > { %v314_v33 = vadd.f32 %v313_v32, %v312_v31  ;;  %v322_v34 = vmul.f32 %v305_v27, %v305_v27  ;;  %v323_v35 = vmul.f32 %v306_v28, %v306_v28 }
  0xa7   : > { %310 = vst.msk [vmem:[%s204_s6] sm:$0xf] %vm309_vm3, %v307_v29 }
  0xa8   : > { %311 = vst.msk [vmem:[%s204_s6 + $0x4] sm:$0xf] %vm309_vm3, %v308_v30  ;;  %v315_v36 = vrot.slane %v314_v33, 4  ;;  %v324_v37 = vsel %vm228_vm0, %v322_v34, 0.0  ;;  %v325_v38 = vsel %vm228_vm0, %v323_v35, 0.0 }
  0xa9   : > { %v326_v39 = vadd.f32 %v325_v38, %v324_v37 }
  0xaa   : > { %v316_v40 = vadd.f32 %v315_v36, %v314_v33 }
  0xab   : > { %v327_v41 = vrot.slane %v326_v39, 4 }
  0xac   : > { %v317_v42 = vrot.slane %v316_v40, 2 }
  0xad   : > { %v328_v43 = vadd.f32 %v327_v41, %v326_v39 }
  0xae   : > { %v318_v44 = vadd.f32 %v317_v42, %v316_v40 }
  0xaf   : > { %v329_v45 = vrot.slane %v328_v43, 2 }
  0xb0   : > { %v319_v46 = vrot.slane %v318_v44, 1 }
  0xb1   : > { %v330_v47 = vadd.f32 %v329_v45, %v328_v43 }
  0xb2   : > { %v320_v49 = vadd.f32 %v319_v46, %v318_v44 }
  0xb3   : > { %v331_v48 = vrot.slane %v330_v47, 1 }
  0xb5   : > { %v332_v50 = vadd.f32 %v331_v48, %v330_v47 }
  0xb7   : > { %v335_v51 = vsel %vm334_vm4, %v320_v49, %v332_v50 }
  0xb8   : > { %337 = vst.msk [vmem:[%s208_s10] sm:$0x3] %vm336_vm5, %v335_v51 }
  0xb9 PF: > { %s15_s15 = sadd.s32 1, %s475_s15  }
  0xba   : > { %p12_p4 = scmp.ge.s32.totalorder %s15_s15, 4  }
  0xbc   :  { %14 = sbr.rel (!%p12_p4) target bundleno = 1 (0x1), region = 76 }

// kernel: conv_layer_forward.3
= control target key start
LH: loop header
LB: loop body
LE: loop exit
PB: predicated region body
PF: predicated region fallthrough
CT: control target
= control target key end

     0   :  { %8 = vsyncpa [#allocation4], 0  ;;  %s527_s0 = inlined_call_operand.vmem [shape: bf16[2,16,16], index: 0, kind: input, shape index: {}]   ;;  %s528_s1 = inlined_call_operand.vmem [shape: f32[1,16], index: 1, kind: input, shape index: {}]   ;;  %s529_s2 = inlined_call_operand.vmem [shape: f32[1,16], index: 2, kind: input, shape index: {}]   ;;  %s530_s3 = inlined_call_operand.hbm [shape: f32[2,8,16], index: 3, kind: output, shape index: {}]  }
   0x1   :  { %10 = vsyncpa [#allocation4 + $0x1], 0  ;;  %s433_s12 = smov 0   ;;  %s435_s13 = smov 0  }
   0x2   :  { %s437_s14 = smov 0   ;;  %s439_s15 = smov 0  }
   0x3 LB: > { %s454_s16 = sadd.s32 4294967295, %s411_s15   ;;  %s286_s17 = sadd.s32 4294967294, %s411_s15   ;;  %s411_s15 = sphi %s439_s15, %s536_s15   ;;  %s407_s14 = sphi %s437_s14, %s535_s14   ;;  %s403_s13 = sphi %s435_s13, %s534_s13   ;;  %s399_s12 = sphi %s433_s12, %s533_s12  }
   0x4   : > { %s458_s18 = sadd.s32 1, %s411_s15   ;;  %s91_s19 = sadd.s32 1, %s407_s14 }
   0x5   : > { %s88_s20 = ssub.s32 %s411_s15, %s458_s18  ;;  %p101_p0 = scmp.ne.s32.totalorder %s407_s14, %s403_s13 }
   0x6   : > { %p89_p1 = scmp.eq.s32.totalorder %s88_s20, 0  ;;  %p102_p2 = scmp.eq.s32.totalorder %s454_s16, 1 }
   0x7   : > { %p107_p3 = scmp.ne.s32.totalorder %s403_s13, %s399_s12  ;;  %p108_p4 = scmp.eq.s32.totalorder %s286_s17, 1 }
   0x8   : > { %s469_s21 = scalar_select %p89_p1, %s407_s14, %s91_s19  }
   0x9   : > { %p471_p5 = por %p102_p2, %p101_p0  ;;  %p475_p6 = por %p108_p4, %p107_p3 }
   0xa   : > { %p289_p7 = scmp.ge.s32.totalorder %s411_s15, 1  ;;  %p140_p8 = scmp.lt.s32.totalorder %s411_s15, 3 }
   0xc   : > { %p141_p9 = pnand %p289_p7, %p140_p8 }
   0xd   : > { %p164_p10 = scmp.lt.s32.totalorder (!%p141_p9), %s454_s16, 1  ;;  %s161_s6 = sand.u32 (!%p141_p9), 1, %s403_s13  }
   0xe   : > { %144 = sbr.rel (%p141_p9) target bundleno = 63 (0x3f), region = 32  ;;  %s290_s7 = sshll.u32 (!%p141_p9), %s161_s6, 3 }
   0xf   : > { %s296_s8 = sshll.u32 (!%p141_p9), %s454_s16, 3  ;;  %s163_s17 = scalar_lea.vmem (!%p141_p9), [#allocation3], %s290_s7 }
  0x10   : > { %s222_s11 = scalar_lea.hbm (!%p141_p9), %s530_s3, %s296_s8  ;;  %s224_s19 = sshll.u32 (!%p141_p9), %s163_s17, 4  ;;  %s225_s19 = int_to_ptr.vmem [resolvable:$true] %s224_s19 }
  0x11   : > { %s226_s20 = sshll.u32 (!%p141_p9), %s222_s11, 4  ;;  %s227_s20 = int_to_ptr.hbm [resolvable:$true] %s226_s20 }
  0x13   : > { %s165_s24 = scalar_select %p164_p10, %s454_s16, 1  ;;  %v343_v0 = vld [vmem:[%s528_s1] ss:$0 sm:$0xff]  ;;  %vm197_vm1 = vcmask 130048   ;;  %vm206_vm3 = vcmask 1040384  }
  0x14   : > { %v344_v3 = vld [vmem:[%s529_s2] ss:$0 sm:$0xff]  ;;  %s212_s16 = scalar_lea.sflag [#allocation4], %s161_s6 }
  0x15   : > { %s299_s25 = sshll.u32 %s165_s24, 3  ;;  %s363_s24 = sshra.s32 %s227_s20, 4  ;;  %s364_s24 = int_to_ptr.hbm [resolvable:$true] %s363_s24 }
  0x16   : > { %s168_s28 = scalar_lea.vmem %s527_s0, %s299_s25  ;;  %s365_s25 = scalar_lea.hbm %s364_s24, 8 }
  0x17   : > { %v301_v1 = vld [vmem:[%s168_s28] sm:$0xff]   ;;  %p366_p11 = scmp.ne.s32.totalorder %s364_s24, %s365_s25  ;;  %s369_s28 = scalar_lea.hbm %s530_s3, 16 }
  0x18   : > { %v302_v2 = vunpack.c.l.bf16 %v301_v1  ;;  %v303_v4 = vunpack.c.h.bf16 %v301_v1  ;;  %p370_p0 = scmp.lt.s32.totalorder %s364_s24, %s530_s3  ;;  %p371_p1 = scmp.lt.s32.totalorder %s369_s28, %s365_s25 }
  0x19   : > { %p367_p12 = pnand %p366_p11, %p471_p5 }
  0x1a   : > { %v178_v5 = vmul.f32 %v343_v0, %v302_v2  ;;  %v179_v6 = vmul.f32 %v343_v0, %v303_v4  ;;  %p372_p2 = por %p371_p1, %p370_p0 }
  0x1b   : > { %p368_p13 = pneg %p367_p12 }
  0x1c   : > { %v183_v7 = vadd.f32 %v344_v3, %v178_v5  ;;  %v184_v8 = vadd.f32 %v344_v3, %v179_v6 }
  0x1d   : > { %p373_p3 = pnand %p372_p2, %p368_p13 }
  0x1e   : > { %v187_v9 = vmin.f32 %v183_v7, 0.0  ;;  %v188_v10 = vmin.f32 %v184_v8, 0.0  ;;  %vm185_vm0 = vcmp.gt.f32.partialorder %v183_v7, 0.0  ;;  %vm186_vm2 = vcmp.gt.f32.partialorder %v184_v8, 0.0 }
  0x20   : > { %v189_v11 = vmul.f32 1.442695, %v187_v9  ;;  %v191_v12 = vmul.f32 1.442695, %v188_v10 }
  0x22   : > { %345 = vpow2.f32 %v189_v11 }
  0x23   : > { %347 = vpow2.f32 %v191_v12 }
  0x28   : > { %v346_v13 = vpop.eup %345 }
  0x29   : > { %v348_v14 = vpop.eup %347  ;;  %v293_v15 = vadd.f32 -1.0, %v346_v13 }
  0x2a   : > { %v294_v16 = vadd.f32 -1.0, %v348_v14 }
  0x2b   : > { %v195_v17 = vsel %vm185_vm0, %v183_v7, %v293_v15 }
  0x2c   : > { %198 = vst.msk [vmem:[#allocation2] sm:$0xff] %vm197_vm1, %v195_v17  ;;  %v196_v18 = vsel %vm186_vm2, %v184_v8, %v294_v16 }
  0x2d   : > { %199 = vst.msk [vmem:[#allocation2 + $0x8] sm:$0xff] %vm197_vm1, %v196_v18 }
  0x34   : > { %v202_v19 = vld [vmem:[#allocation2 + $0x1] ss:$2 sm:$0xff]  ;;  %v200_v21 = vld [vmem:[#allocation2] ss:$2 sm:$0xff] }
  0x35   : > { %v204_v20 = vrot.slane %v202_v19, 7 }
  0x37   : > { %v207_v22 = vsel %vm206_vm3, -1e+30, %v204_v20 }
  0x38   : > { %v208_v23 = vmax.f32 %v207_v22, %v200_v21 }
  0x3a   : > { %v209_v24 = vmax.f32 %v208_v23, %v202_v19 }
  0x3c   : > { %210 = vst.msk [vmem:[%s163_s17] sm:$0xff] %vm197_vm1, %v209_v24 }
  0x3d   : > { %376 = shalt.err (!%p373_p3)
}
  0x3e   : > { %304 = dma.vmem_to_hbm [thread:$0]  (%p471_p5), %s225_s19, 128, %s227_s20, %s212_s16  }
  0x3f PF: > { %p310_p4 = scmp.ge.s32.totalorder %s411_s15, 2  ;;  %s238_s4 = sand.u32 1, %s399_s12  }
  0x40   : > { %s239_s5 = scalar_lea.sflag [#allocation4], %s238_s4 }
  0x41   : > { %p307_p7 = pnand %p310_p4, %p475_p6 }
  0x43   : > { %p308_p8 = pneg %p307_p7 }
  0x45   : > { %394 = dma.done.wait (%p308_p8), %s239_s5, 128  }
  0x46   : > { %396 = vsyncadd (%p308_p8), %s239_s5, 4294967168  ;;  %p13_p9 = scmp.ge.s32.totalorder %s458_s18, 4   ;;  %s533_s12 = smov %s403_s13 }
  0x47   : > { %s534_s13 = smov %s407_s14  ;;  %s535_s14 = smov %s469_s21 }
  0x48   : > { %s536_s15 = smov %s458_s18  ;;  %15 = sbr.rel (!%p13_p9) target bundleno = 3 (0x3), region = 68 }
  0x4d   :  { %245 = vsyncpa [#allocation4], 1 }
  0x4e   :  { %247 = vsyncpa [#allocation4 + $0x1], 1 }

</bundles_post_ra>
